<compile_context>
chip_gen: v6e
topology: v6e:2x2x1
jax: 0.10.0
libtpu: 0.0.40
codegen_flags: <defaults>
</compile_context>

<pallas_src>
import jax
import jax.numpy as jnp
from jax.experimental import pallas as pl
from jax.experimental.pallas import tpu as pltpu


def _cvx_kernel(x_ref, rhs_ref, o_ref):
    # x_ref  : (d, tn)   batch tile, transposed (lanes = batch rows)
    # rhs_ref: (2P, d)   [h^T ; (v - w)^T], resident across the batch grid
    # o_ref  : (1, tn)   lane-dense per-row sums for this tile
    two_p = rhs_ref.shape[0]
    p = two_p // 2

    # Single fused MXU matmul for both the sign and the value projections.
    z = jnp.dot(rhs_ref[...], x_ref[...],
                preferred_element_type=jnp.float32)        # (2P, tn)

    s = z[:p, :]        # (x @ h)^T          (sublane-aligned split when P % 8 == 0)
    xvw = z[p:, :]      # (x @ (v - w))^T
    masked = jnp.where(s >= 0.0, xvw, 0.0)                 # D * Xv_w

    # Reduce over the neuron (sublane) axis -> already lane-dense (1, tn).
    o_ref[...] = jnp.sum(masked, axis=0, keepdims=True).astype(o_ref.dtype)


def _round_up(a, b):
    return (a + b - 1) // b * b


def custom_cvx_forward(x, v, w, h, *, tn=256):
    """Pallas equivalent of custom_cvx_layer.forward.

    x: (N, d) float32;  v, w, h: (d, P) float32;  returns (N, 1) float32.
    """
    N, d = x.shape
    P = h.shape[1]

    # ---- glue (cheap XLA prep outside the kernel) ---------------------------
    # Fused operand: (2P, d) so the kernel issues a single MXU matmul.
    rhs = jnp.concatenate([h, v - w], axis=1).T            # (2P, d)
    # TODO(synk): for very large d*P, tile P with an accumulator grid axis
    # (pl.when init/finalize, axis "arbitrary") instead of keeping the whole
    # (2P, d) operand resident — matters for v7x's 64 MiB VMEM.

    # ---- tile-size selection ------------------------------------------------
    # Keep resident weights + double-buffered x tile + out well inside VMEM.
    vmem_budget = 24 * 1024 * 1024

    def _vmem_bytes(t):
        return 4 * (2 * d * t + 2 * (2 * P) * d + 2 * t)

    tn_eff = max(128, (tn // 128) * 128)
    while tn_eff > 128 and _vmem_bytes(tn_eff) > vmem_budget:
        tn_eff -= 128
    # Small batches: shrink the tile to the 8-aligned padded batch so a single
    # block spans the whole (padded) array and (8,128) layout rules hold.
    tn_eff = min(tn_eff, _round_up(N, 8))

    n_pad = _round_up(N, tn_eff)
    xt = x.T                                               # (d, N) layout plumbing
    if n_pad != N:
        xt = jnp.pad(xt, ((0, 0), (0, n_pad - N)))         # zero rows -> zero output

    grid = (n_pad // tn_eff,)
    y = pl.pallas_call(
        _cvx_kernel,
        out_shape=jax.ShapeDtypeStruct((1, n_pad), jnp.float32),
        grid_spec=pltpu.PrefetchScalarGridSpec(
            num_scalar_prefetch=0,
            grid=grid,
            in_specs=[
                pl.BlockSpec((d, tn_eff), lambda i: (0, i)),    # x tile (transposed)
                pl.BlockSpec((2 * P, d), lambda i: (0, 0)),     # fused weights (resident)
            ],
            out_specs=pl.BlockSpec((1, tn_eff), lambda i: (0, i)),  # lane-dense output
        ),
        compiler_params=pltpu.CompilerParams(
            dimension_semantics=("parallel",),   # batch loop shards across TCs (v7x)
        ),
    )(xt, rhs)

    return y[0, :N].reshape(N, 1)


def _reference(x, v, w, h):
    s = (x @ h) >= 0
    xvw = x @ (v - w)
    return jnp.sum(jnp.where(s, xvw, 0.0), axis=1, keepdims=True)


if __name__ == "__main__":
    # Small shapes consistent with the module: N rows of dimension d and
    # P = num_neurons sign-pattern neurons.  N is deliberately NOT a multiple
    # of the batch tile to exercise the cdiv/padding path.
    N, d, P = 300, 32, 128

    key = jax.random.PRNGKey(0)
    kx, kv, kw, kh = jax.random.split(key, 4)

    x = jax.random.normal(kx, (N, d), dtype=jnp.float32)
    # The module zero-inits v/w (trainable) and loads h from u_vector_list; we
    # use deterministic random values so the compute path is actually
    # exercised (zeros would give a trivially-zero output, same semantics).
    v = jax.random.normal(kv, (d, P), dtype=jnp.float32) * 0.1
    w = jax.random.normal(kw, (d, P), dtype=jnp.float32) * 0.1
    h = jax.random.normal(kh, (d, P), dtype=jnp.float32)

    y = custom_cvx_forward(x, v, w, h)
    y = jax.block_until_ready(y)

    y_ref = _reference(x, v, w, h)
    assert y.shape == (N, 1)
    assert jnp.allclose(y, y_ref, atol=1e-4, rtol=1e-4), "mismatch vs reference"

    print("KERNEL_OK")
</pallas_src>

<mosaic_0001>
module attributes {stable_mosaic.version = 11 : i64} {
  func.func @_cvx_kernel(%arg0: i32, %arg1: memref<32x256xf32, #tpu.memory_space<vmem>>, %arg2: memref<256x32xf32, #tpu.memory_space<vmem>>, %arg3: memref<1x256xf32, #tpu.memory_space<vmem>>) attributes {dimension_semantics = [#tpu.dimension_semantics<parallel>], iteration_bounds = array<i64: 2>, scalar_prefetch = 0 : i64, scratch_operands = 0 : i64, tpu.core_type = #tpu.core_type<tc>, window_params = [{transform_indices = @transform_0, window_bounds = array<i64: 32, 256>}, {pipeline_mode = #tpu.pipeline_mode<synchronous>, transform_indices = @transform_1, window_bounds = array<i64: 256, 32>}, {transform_indices = @transform_2, window_bounds = array<i64: 1, 256>}]} {
    %c0 = arith.constant 0 : index
    %c0_0 = arith.constant 0 : index
    %0 = vector.load %arg2[%c0, %c0_0] : memref<256x32xf32, #tpu.memory_space<vmem>>, vector<256x32xf32>
    %c0_1 = arith.constant 0 : index
    %c0_2 = arith.constant 0 : index
    %1 = vector.load %arg1[%c0_1, %c0_2] : memref<32x256xf32, #tpu.memory_space<vmem>>, vector<32x256xf32>
    %cst = arith.constant dense<0.000000e+00> : vector<256x256xf32>
    %2 = tpu.matmul %0, %1, %cst {dimension_numbers = #tpu.dot_dimension_numbers<[1], [0], [0], [1], [0, 0, 1, 1], [], []>} : vector<256x32xf32>, vector<32x256xf32>, vector<256x256xf32> -> vector<256x256xf32>
    %3 = vector.extract_strided_slice %2 {offsets = [0, 0], sizes = [128, 256], strides = [1, 1]} : vector<256x256xf32> to vector<128x256xf32>
    %4 = vector.extract_strided_slice %2 {offsets = [128, 0], sizes = [128, 256], strides = [1, 1]} : vector<256x256xf32> to vector<128x256xf32>
    %cst_3 = arith.constant 0.000000e+00 : f32
    %5 = vector.broadcast %cst_3 : f32 to vector<128x256xf32>
    %6 = arith.cmpf oge, %3, %5 : vector<128x256xf32>
    %cst_4 = arith.constant 0.000000e+00 : f32
    %7 = vector.broadcast %cst_4 : f32 to vector<128x256xf32>
    %8 = arith.select %6, %4, %7 : vector<128x256xi1>, vector<128x256xf32>
    %cst_5 = arith.constant dense<0.000000e+00> : vector<256xf32>
    %9 = vector.multi_reduction <add>, %8, %cst_5 [0] : vector<128x256xf32> to vector<256xf32>
    %10 = vector.shape_cast %9 : vector<256xf32> to vector<1x256xf32>
    %c0_6 = arith.constant 0 : index
    %c0_7 = arith.constant 0 : index
    %11 = vector.load %arg3[%c0_6, %c0_7] : memref<1x256xf32, #tpu.memory_space<vmem>>, vector<1x256xf32>
    tpu.vector_store %arg3[%c0_6, %c0_7], %10 {strides = array<i32>} : memref<1x256xf32, #tpu.memory_space<vmem>>, vector<1x256xf32>,
    return
  }
  func.func @transform_0(%arg0: i32) -> (i32, i32) {
    %c0_i32 = arith.constant 0 : i32
    %c0_i32_0 = arith.constant 0 : i32
    return %c0_i32, %arg0 : i32, i32
  }
  func.func @transform_1(%arg0: i32) -> (i32, i32) {
    %c0_i32 = arith.constant 0 : i32
    %c0_i32_0 = arith.constant 0 : i32
    %c0_i32_1 = arith.constant 0 : i32
    return %c0_i32, %c0_i32_0 : i32, i32
  }
  func.func @transform_2(%arg0: i32) -> (i32, i32) {
    %c0_i32 = arith.constant 0 : i32
    %c0_i32_0 = arith.constant 0 : i32
    return %c0_i32, %arg0 : i32, i32
  }
}

</mosaic_0001>

<bundles_post_ra>
// kernel: tpu_custom_call.1
= control target key start
LH: loop header
LB: loop body
LE: loop exit
PB: predicated region body
PF: predicated region fallthrough
CT: control target
= control target key end

     0   :  { %7 = vsyncpa [#allocation4], 0  ;;  %s1215_s0 = inlined_call_operand.vmem [shape: f32[32,512], index: 0, kind: input, shape index: {}]   ;;  %s1216_s1 = inlined_call_operand.vmem [shape: f32[256,32], index: 1, kind: input, shape index: {}]   ;;  %s1217_s2 = inlined_call_operand.hbm [shape: f32[1,512], index: 2, kind: output, shape index: {}]  }
   0x1   :  { %9 = vsyncpa [#allocation4 + $0x1], 0  ;;  %s958_s9 = smov 0   ;;  %s960_s10 = smov 0  }
   0x2   :  { %s962_s11 = smov 0   ;;  %s964_s12 = smov 0  }
   0x3 LB: > { %s780_s13 = sadd.s32 4294967295, %s938_s12   ;;  %s781_s14 = sadd.s32 4294967294, %s938_s12   ;;  %s938_s12 = sphi %s964_s12, %s1225_s12   ;;  %s934_s11 = sphi %s962_s11, %s1224_s11   ;;  %s930_s10 = sphi %s960_s10, %s1223_s10   ;;  %s926_s9 = sphi %s958_s9, %s1222_s9  }
   0x4   : > { %s981_s15 = sadd.s32 1, %s938_s12   ;;  %s22_s16 = sadd.s32 1, %s934_s11 }
   0x5   : > { %s19_s17 = ssub.s32 %s938_s12, %s981_s15  ;;  %p29_p0 = scmp.ne.s32.totalorder %s934_s11, %s930_s10 }
   0x6   : > { %p20_p1 = scmp.eq.s32.totalorder %s19_s17, 0  ;;  %p30_p2 = scmp.eq.s32.totalorder %s938_s12, 0 }
   0x7   : > { %p80_p3 = scmp.eq.s32.totalorder %s780_s13, 1  ;;  %p85_p4 = scmp.ne.s32.totalorder %s930_s10, %s926_s9 }
   0x8   : > { %s994_s18 = scalar_select %p20_p1, %s934_s11, %s22_s16  }
   0x9   : > { %p31_p5 = por %p30_p2, %p29_p0  ;;  %p996_p6 = por %p80_p3, %p29_p0 }
   0xa   : > { %p86_p7 = scmp.eq.s32.totalorder %s781_s14, 1  ;;  %p1218_p9 = scmp.ge.s32.totalorder %s938_s12, 2 }
   0xc   : > { %p1000_p8 = por %p86_p7, %p85_p4  ;;  %105 = sbr.rel (%p1218_p9) target bundleno = 25 (0x19), region = 20 }
  0x11   : > { %108 = sbr.rel (!%p31_p5) target bundleno = 25 (0x19), region = 24  ;;  %s110_s21 = sand.u32 (%p31_p5), 1, %s934_s11  }
  0x12   : > { %s827_s22 = sshll.u32 (%p31_p5), %s938_s12, 4  ;;  %s784_s23 = sshll.u32 (%p31_p5), %s110_s21, 6 }
  0x13   : > { %s115_s26 = scalar_lea.vmem (%p31_p5), %s1215_s0, %s827_s22  ;;  %s112_s27 = scalar_lea.vmem (%p31_p5), [#allocation2], %s784_s23 }
  0x14   : > { %v128_v0 = vld [vmem:[%s115_s26] sm:$0xff] (%p31_p5)  ;;  %v130_v1 = vld [vmem:[%s115_s26 + $0x8] sm:$0xff] (%p31_p5) }
  0x15   : > { %v132_v2 = vld [vmem:[%s115_s26 + $0x20] sm:$0xff] (%p31_p5)  ;;  %129 = vst [vmem:[%s112_s27] sm:$0xff] (%p31_p5), %v128_v0  ;;  %131 = vst [vmem:[%s112_s27 + $0x8] sm:$0xff] (%p31_p5), %v130_v1  ;;  %v134_v3 = vld [vmem:[%s115_s26 + $0x28] sm:$0xff] (%p31_p5) }
  0x16   : > { %133 = vst [vmem:[%s112_s27 + $0x10] sm:$0xff] %v132_v2  ;;  %v136_v4 = vld [vmem:[%s115_s26 + $0x40] sm:$0xff]  ;;  %v138_v5 = vld [vmem:[%s115_s26 + $0x48] sm:$0xff]  ;;  %135 = vst [vmem:[%s112_s27 + $0x18] sm:$0xff] %v134_v3 }
  0x17   : > { %137 = vst [vmem:[%s112_s27 + $0x20] sm:$0xff] %v136_v4  ;;  %139 = vst [vmem:[%s112_s27 + $0x28] sm:$0xff] %v138_v5  ;;  %v140_v6 = vld [vmem:[%s115_s26 + $0x60] sm:$0xff]  ;;  %v142_v7 = vld [vmem:[%s115_s26 + $0x68] sm:$0xff] }
  0x18   : > { %141 = vst [vmem:[%s112_s27 + $0x30] sm:$0xff] %v140_v6  ;;  %143 = vst [vmem:[%s112_s27 + $0x38] sm:$0xff] %v142_v7 }
  0x19 PF: > { %p787_p10 = scmp.ge.s32.totalorder %s938_s12, 1  ;;  %p148_p11 = scmp.lt.s32.totalorder %s938_s12, 3 }
  0x1b   : > { %p149_p12 = pnand %p787_p10, %p148_p11 }
  0x1c   : > { %s1015_s28 = sand.u32 (!%p149_p12), 1, %s930_s10   ;;  %s828_s23 = sshll.u32 (!%p149_p12), %s780_s13, 5 }
  0x1d   : > { %152 = sbr.rel (%p149_p12) target bundleno = 334 (0x14e), region = 47  ;;  %s788_s29 = sshll.u32 (!%p149_p12), %s1015_s28, 6 }
  0x1e   : > { %s157_s30 = scalar_lea.vmem (!%p149_p12), [#allocation2], %s788_s29  ;;  %s789_s22 = sshll.u32 (!%p149_p12), %s1015_s28, 1 }
  0x1f   : > { %s175_s24 = scalar_lea.vmem (!%p149_p12), [#allocation3], %s789_s22  ;;  %s714_s29 = scalar_lea.hbm (!%p149_p12), %s1217_s2, %s828_s23 }
  0x20   : > { %s716_s25 = sshll.u32 (!%p149_p12), %s175_s24, 4  ;;  %s942_s4 = smov (!%p149_p12), [#allocation3]   ;;  %s717_s25 = int_to_ptr.vmem [resolvable:$true] %s716_s25 }
  0x21   : > { %s878_s3 = scalar_lea.vmem (!%p149_p12), %s717_s25, 32  ;;  %s882_s5 = sshll.u32 (!%p149_p12), %s942_s4, 4  ;;  %s883_s5 = int_to_ptr.vmem [resolvable:$false] %s882_s5 }
  0x22   : > { %v940_v8 = vmov 0.0   ;;  %v217_v9 = vld [vmem:[%s157_s30 + $0x38] sm:$0xff]  ;;  %v216_v10 = vld [vmem:[%s157_s30 + $0x30] sm:$0xff]  ;;  %v215_v11 = vld [vmem:[%s157_s30 + $0x28] sm:$0xff]  ;;  %vm218_vm0 = vcmask 261120   ;;  %p879_p13 = scmp.ne.s32.totalorder %s717_s25, %s878_s3  ;;  %s884_s13 = scalar_lea.vmem %s883_s5, 64 }
  0x23   : > { %379 = vmatprep.mubr.f32.mxu0 %v940_v8  ;;  %475 = vmatprep.mubr.f32.mxu1 %v940_v8  ;;  %v214_v12 = vld [vmem:[%s157_s30 + $0x20] sm:$0xff]  ;;  %v213_v13 = vld [vmem:[%s157_s30 + $0x18] sm:$0xff]  ;;  %v212_v14 = vld [vmem:[%s157_s30 + $0x10] sm:$0xff]  ;;  %p885_p2 = scmp.lt.s32.totalorder %s717_s25, %s883_s5  ;;  %p886_p3 = scmp.lt.s32.totalorder %s884_s13, %s878_s3 }
  0x24   : > { %339 = vmatprep.subr.mxu0 %v217_v9  ;;  %829 = vmatprep.subr.mxu1 %v217_v9  ;;  %v211_v15 = vld [vmem:[%s157_s30 + $0x8] sm:$0xff]  ;;  %v210_v16 = vld [vmem:[%s157_s30] sm:$0xff]  ;;  %v180_v21 = vld [vmem:[%s1216_s1 + $0x10] sm:$0xff]  ;;  %s702_s30 = scalar_lea.sflag [#allocation4], %s1015_s28  ;;  %p880_p0 = pnand %p879_p13, %p996_p6 }
  0x25   : > { %340 = vmatpush1.msra.mxu0 %v216_v10  ;;  %833 = vmatpush1.msra.mxu1 %v216_v10  ;;  %v178_v17 = vld [vmem:[%s1216_s1] sm:$0xff]  ;;  %v179_v19 = vld [vmem:[%s1216_s1 + $0x8] sm:$0xff]  ;;  %v196_v22 = vld [vmem:[%s1216_s1 + $0x90] sm:$0xff]  ;;  %p887_p4 = por %p886_p3, %p885_p2 }
  0x26   : > { %341 = vmatprep.subr.mxu0 %v215_v11  ;;  %830 = vmatprep.subr.mxu1 %v215_v11  ;;  %v194_v18 = vld [vmem:[%s1216_s1 + $0x80] sm:$0xff]  ;;  %v195_v20 = vld [vmem:[%s1216_s1 + $0x88] sm:$0xff]  ;;  %v181_v23 = vld [vmem:[%s1216_s1 + $0x18] sm:$0xff]  ;;  %p881_p1 = pneg %p880_p0 }
  0x27   : > { %342 = vmatpush1.msra.mxu0 %v214_v12  ;;  %834 = vmatpush1.msra.mxu1 %v214_v12  ;;  %v197_v24 = vld [vmem:[%s1216_s1 + $0x98] sm:$0xff]  ;;  %v182_v25 = vld [vmem:[%s1216_s1 + $0x20] sm:$0xff]  ;;  %v183_v27 = vld [vmem:[%s1216_s1 + $0x28] sm:$0xff] }
  0x28   : > { %343 = vmatprep.subr.mxu0 %v213_v13  ;;  %831 = vmatprep.subr.mxu1 %v213_v13  ;;  %v198_v26 = vld [vmem:[%s1216_s1 + $0xa0] sm:$0xff]  ;;  %v199_v28 = vld [vmem:[%s1216_s1 + $0xa8] sm:$0xff]  ;;  %v184_v29 = vld [vmem:[%s1216_s1 + $0x30] sm:$0xff]  ;;  %p888_p5 = pnand %p887_p4, %p881_p1 }
  0x29   : > { %344 = vmatpush1.msra.mxu0 %v212_v14  ;;  %835 = vmatpush1.msra.mxu1 %v212_v14  ;;  %v200_v30 = vld [vmem:[%s1216_s1 + $0xb0] sm:$0xff]  ;;  %v185_v31 = vld [vmem:[%s1216_s1 + $0x38] sm:$0xff]  ;;  %v186_v33 = vld [vmem:[%s1216_s1 + $0x40] sm:$0xff] }
  0x2a   : > { %345 = vmatprep.subr.mxu0 %v211_v15  ;;  %832 = vmatprep.subr.mxu1 %v211_v15  ;;  %v201_v32 = vld [vmem:[%s1216_s1 + $0xb8] sm:$0xff]  ;;  %v202_v34 = vld [vmem:[%s1216_s1 + $0xc0] sm:$0xff]  ;;  %v187_v35 = vld [vmem:[%s1216_s1 + $0x48] sm:$0xff] }
  0x2b   : > { %346 = vmatpush1.msra.mxu0 %v210_v16  ;;  %836 = vmatpush1.msra.mxu1 %v210_v16  ;;  %v203_v36 = vld [vmem:[%s1216_s1 + $0xc8] sm:$0xff]  ;;  %v188_v37 = vld [vmem:[%s1216_s1 + $0x50] sm:$0xff]  ;;  %v189_v39 = vld [vmem:[%s1216_s1 + $0x58] sm:$0xff] }
  0x2c   : > { %790 = vmatmul.mubr.msk.f32.vlgmr.msra.gmra.mxu0 %vm218_vm0, %v178_v17  ;;  %806 = vmatmul.mubr.msk.f32.vlgmr.msra.gmra.mxu1 %vm218_vm0, %v194_v18  ;;  %v204_v38 = vld [vmem:[%s1216_s1 + $0xd0] sm:$0xff]  ;;  %v205_v40 = vld [vmem:[%s1216_s1 + $0xd8] sm:$0xff]  ;;  %v190_v41 = vld [vmem:[%s1216_s1 + $0x60] sm:$0xff] }
  0x2d   : > { %385 = vmatprep.mubr.f32.mxu0 %v940_v8  ;;  %481 = vmatprep.mubr.f32.mxu1 %v940_v8  ;;  %v206_v42 = vld [vmem:[%s1216_s1 + $0xe0] sm:$0xff]  ;;  %v191_v43 = vld [vmem:[%s1216_s1 + $0x68] sm:$0xff]  ;;  %v192_v45 = vld [vmem:[%s1216_s1 + $0x70] sm:$0xff] }
  0x2e   : > { %v207_v44 = vld [vmem:[%s1216_s1 + $0xe8] sm:$0xff]  ;;  %v208_v46 = vld [vmem:[%s1216_s1 + $0xf0] sm:$0xff]  ;;  %v193_v47 = vld [vmem:[%s1216_s1 + $0x78] sm:$0xff] }
  0x2f   : > { %v209_v48 = vld [vmem:[%s1216_s1 + $0xf8] sm:$0xff] }
  0x30   : > { %791 = vmatmul.mubr.msk.f32.gmra.mxu0 %vm218_vm0, %v179_v19  ;;  %807 = vmatmul.mubr.msk.f32.gmra.mxu1 %vm218_vm0, %v195_v20 }
  0x31   : > { %391 = vmatprep.mubr.f32.mxu0 %v940_v8  ;;  %487 = vmatprep.mubr.f32.mxu1 %v940_v8 }
  0x34   : > { %792 = vmatmul.mubr.msk.f32.gmra.mxu0 %vm218_vm0, %v180_v21  ;;  %808 = vmatmul.mubr.msk.f32.gmra.mxu1 %vm218_vm0, %v196_v22 }
  0x35   : > { %397 = vmatprep.mubr.f32.mxu0 %v940_v8  ;;  %493 = vmatprep.mubr.f32.mxu1 %v940_v8 }
  0x38   : > { %793 = vmatmul.mubr.msk.f32.gmra.mxu0 %vm218_vm0, %v181_v23  ;;  %809 = vmatmul.mubr.msk.f32.gmra.mxu1 %vm218_vm0, %v197_v24 }
  0x39   : > { %403 = vmatprep.mubr.f32.mxu0 %v940_v8  ;;  %499 = vmatprep.mubr.f32.mxu1 %v940_v8 }
  0x3c   : > { %794 = vmatmul.mubr.msk.f32.gmra.mxu0 %vm218_vm0, %v182_v25  ;;  %810 = vmatmul.mubr.msk.f32.gmra.mxu1 %vm218_vm0, %v198_v26 }
  0x3d   : > { %409 = vmatprep.mubr.f32.mxu0 %v940_v8  ;;  %505 = vmatprep.mubr.f32.mxu1 %v940_v8 }
  0x40   : > { %795 = vmatmul.mubr.msk.f32.gmra.mxu0 %vm218_vm0, %v183_v27  ;;  %811 = vmatmul.mubr.msk.f32.gmra.mxu1 %vm218_vm0, %v199_v28 }
  0x41   : > { %415 = vmatprep.mubr.f32.mxu0 %v940_v8  ;;  %511 = vmatprep.mubr.f32.mxu1 %v940_v8 }
  0x44   : > { %796 = vmatmul.mubr.msk.f32.gmra.mxu0 %vm218_vm0, %v184_v29  ;;  %812 = vmatmul.mubr.msk.f32.gmra.mxu1 %vm218_vm0, %v200_v30 }
  0x45   : > { %421 = vmatprep.mubr.f32.mxu0 %v940_v8  ;;  %517 = vmatprep.mubr.f32.mxu1 %v940_v8 }
  0x48   : > { %797 = vmatmul.mubr.msk.f32.gmra.mxu0 %vm218_vm0, %v185_v31  ;;  %813 = vmatmul.mubr.msk.f32.gmra.mxu1 %vm218_vm0, %v201_v32 }
  0x49   : > { %427 = vmatprep.mubr.f32.mxu0 %v940_v8  ;;  %523 = vmatprep.mubr.f32.mxu1 %v940_v8 }
  0x4c   : > { %798 = vmatmul.mubr.msk.f32.gmra.mxu0 %vm218_vm0, %v186_v33  ;;  %814 = vmatmul.mubr.msk.f32.gmra.mxu1 %vm218_vm0, %v202_v34 }
  0x4d   : > { %433 = vmatprep.mubr.f32.mxu0 %v940_v8  ;;  %529 = vmatprep.mubr.f32.mxu1 %v940_v8 }
  0x50   : > { %799 = vmatmul.mubr.msk.f32.gmra.mxu0 %vm218_vm0, %v187_v35  ;;  %815 = vmatmul.mubr.msk.f32.gmra.mxu1 %vm218_vm0, %v203_v36 }
  0x51   : > { %439 = vmatprep.mubr.f32.mxu0 %v940_v8  ;;  %535 = vmatprep.mubr.f32.mxu1 %v940_v8 }
  0x54   : > { %800 = vmatmul.mubr.msk.f32.gmra.mxu0 %vm218_vm0, %v188_v37  ;;  %816 = vmatmul.mubr.msk.f32.gmra.mxu1 %vm218_vm0, %v204_v38 }
  0x55   : > { %445 = vmatprep.mubr.f32.mxu0 %v940_v8  ;;  %541 = vmatprep.mubr.f32.mxu1 %v940_v8 }
  0x58   : > { %801 = vmatmul.mubr.msk.f32.gmra.mxu0 %vm218_vm0, %v189_v39  ;;  %817 = vmatmul.mubr.msk.f32.gmra.mxu1 %vm218_vm0, %v205_v40 }
  0x59   : > { %451 = vmatprep.mubr.f32.mxu0 %v940_v8  ;;  %547 = vmatprep.mubr.f32.mxu1 %v940_v8 }
  0x5c   : > { %802 = vmatmul.mubr.msk.f32.gmra.mxu0 %vm218_vm0, %v190_v41  ;;  %818 = vmatmul.mubr.msk.f32.gmra.mxu1 %vm218_vm0, %v206_v42 }
  0x5d   : > { %457 = vmatprep.mubr.f32.mxu0 %v940_v8  ;;  %553 = vmatprep.mubr.f32.mxu1 %v940_v8 }
  0x60   : > { %803 = vmatmul.mubr.msk.f32.gmra.mxu0 %vm218_vm0, %v191_v43  ;;  %819 = vmatmul.mubr.msk.f32.gmra.mxu1 %vm218_vm0, %v207_v44 }
  0x61   : > { %463 = vmatprep.mubr.f32.mxu0 %v940_v8  ;;  %559 = vmatprep.mubr.f32.mxu1 %v940_v8 }
  0x64   : > { %804 = vmatmul.mubr.msk.f32.gmra.mxu0 %vm218_vm0, %v192_v45  ;;  %820 = vmatmul.mubr.msk.f32.gmra.mxu1 %vm218_vm0, %v208_v46 }
  0x65   : > { %469 = vmatprep.mubr.f32.mxu0 %v940_v8  ;;  %565 = vmatprep.mubr.f32.mxu1 %v940_v8 }
  0x68   : > { %805 = vmatmul.mubr.msk.f32.gmra.mxu0 %vm218_vm0, %v193_v47  ;;  %821 = vmatmul.mubr.msk.f32.gmra.mxu1 %vm218_vm0, %v209_v48 }
  0xec   : > { %v381_v49 = vpop.f32.mrf.mxu0  ;;  %v477_v50 = vpop.f32.mrf.mxu1 }
  0xed   : > { %vm572_vm2 = vcmp.ge.f32.partialorder %v381_v49, 0.0 }
  0xee   : > { %v383_v51 = vpop.f32.mrf.mxu0  ;;  %v479_v52 = vpop.f32.mrf.mxu1  ;;  %v604_v20 = vsel %vm572_vm2, %v477_v50, 0.0 }
  0xef   : > { %vm573_vm5 = vcmp.ge.f32.partialorder %v383_v51, 0.0 }
  0xf0   : > { %v387_v53 = vpop.f32.mrf.mxu0  ;;  %v483_v54 = vpop.f32.mrf.mxu1  ;;  %v605_v26 = vsel %vm573_vm5, %v479_v52, 0.0 }
  0xf1   : > { %vm574_vm1 = vcmp.ge.f32.partialorder %v387_v53, 0.0 }
  0xf2   : > { %v389_v55 = vpop.f32.mrf.mxu0  ;;  %v485_v56 = vpop.f32.mrf.mxu1  ;;  %v606_v17 = vsel %vm574_vm1, %v483_v54, 0.0 }
  0xf3   : > { %vm575_vm3 = vcmp.ge.f32.partialorder %v389_v55, 0.0  ;;  %v636_v25 = vadd.f32 %v606_v17, %v604_v20 }
  0xf4   : > { %v393_v57 = vpop.f32.mrf.mxu0  ;;  %v489_v58 = vpop.f32.mrf.mxu1  ;;  %v607_v21 = vsel %vm575_vm3, %v485_v56, 0.0 }
  0xf5   : > { %vm576_vm4 = vcmp.ge.f32.partialorder %v393_v57, 0.0  ;;  %v657_v31 = vadd.f32 %v607_v21, %v605_v26 }
  0xf6   : > { %v395_v59 = vpop.f32.mrf.mxu0  ;;  %v491_v60 = vpop.f32.mrf.mxu1  ;;  %v608_v22 = vsel %vm576_vm4, %v489_v58, 0.0 }
  0xf7   : > { %vm577_vm6 = vcmp.ge.f32.partialorder %v395_v59, 0.0  ;;  %v637_v32 = vadd.f32 %v636_v25, %v608_v22 }
  0xf8   : > { %v399_v61 = vpop.f32.mrf.mxu0  ;;  %v495_v62 = vpop.f32.mrf.mxu1  ;;  %v609_v27 = vsel %vm577_vm6, %v491_v60, 0.0 }
  0xf9   : > { %vm578_vm7 = vcmp.ge.f32.partialorder %v399_v61, 0.0  ;;  %v658_v37 = vadd.f32 %v657_v31, %v609_v27 }
  0xfa   : > { %v401_v63 = vpop.f32.mrf.mxu0  ;;  %v497_v0 = vpop.f32.mrf.mxu1  ;;  %v610_v28 = vsel %vm578_vm7, %v495_v62, 0.0 }
  0xfb   : > { %vm579_vm8 = vcmp.ge.f32.partialorder %v401_v63, 0.0  ;;  %v638_v38 = vadd.f32 %v637_v32, %v610_v28 }
  0xfc   : > { %v405_v1 = vpop.f32.mrf.mxu0  ;;  %v501_v2 = vpop.f32.mrf.mxu1  ;;  %v611_v33 = vsel %vm579_vm8, %v497_v0, 0.0 }
  0xfd   : > { %vm580_vm9 = vcmp.ge.f32.partialorder %v405_v1, 0.0  ;;  %v659_v43 = vadd.f32 %v658_v37, %v611_v33 }
  0xfe   : > { %v407_v3 = vpop.f32.mrf.mxu0  ;;  %v503_v4 = vpop.f32.mrf.mxu1  ;;  %v612_v34 = vsel %vm580_vm9, %v501_v2, 0.0 }
  0xff   : > { %vm581_vm10 = vcmp.ge.f32.partialorder %v407_v3, 0.0  ;;  %v639_v44 = vadd.f32 %v638_v38, %v612_v34 }
 0x100   : > { %v411_v5 = vpop.f32.mrf.mxu0  ;;  %v507_v6 = vpop.f32.mrf.mxu1  ;;  %v613_v39 = vsel %vm581_vm10, %v503_v4, 0.0 }
 0x101   : > { %vm582_vm11 = vcmp.ge.f32.partialorder %v411_v5, 0.0  ;;  %v660_v49 = vadd.f32 %v659_v43, %v613_v39 }
 0x102   : > { %v413_v7 = vpop.f32.mrf.mxu0  ;;  %v509_v8 = vpop.f32.mrf.mxu1  ;;  %v614_v40 = vsel %vm582_vm11, %v507_v6, 0.0 }
 0x103   : > { %vm583_vm12 = vcmp.ge.f32.partialorder %v413_v7, 0.0  ;;  %v640_v50 = vadd.f32 %v639_v44, %v614_v40 }
 0x104   : > { %v417_v9 = vpop.f32.mrf.mxu0  ;;  %v513_v10 = vpop.f32.mrf.mxu1  ;;  %v615_v45 = vsel %vm583_vm12, %v509_v8, 0.0 }
 0x105   : > { %vm584_vm13 = vcmp.ge.f32.partialorder %v417_v9, 0.0  ;;  %v661_v55 = vadd.f32 %v660_v49, %v615_v45 }
 0x106   : > { %v419_v11 = vpop.f32.mrf.mxu0  ;;  %v515_v12 = vpop.f32.mrf.mxu1  ;;  %v616_v46 = vsel %vm584_vm13, %v513_v10, 0.0 }
 0x107   : > { %vm585_vm14 = vcmp.ge.f32.partialorder %v419_v11, 0.0  ;;  %v641_v56 = vadd.f32 %v640_v50, %v616_v46 }
 0x108   : > { %v423_v13 = vpop.f32.mrf.mxu0  ;;  %v519_v14 = vpop.f32.mrf.mxu1  ;;  %v617_v51 = vsel %vm585_vm14, %v515_v12, 0.0 }
 0x109   : > { %vm586_vm15 = vcmp.ge.f32.partialorder %v423_v13, 0.0  ;;  %v662_v61 = vadd.f32 %v661_v55, %v617_v51 }
 0x10a   : > { %v425_v15 = vpop.f32.mrf.mxu0  ;;  %v521_v16 = vpop.f32.mrf.mxu1  ;;  %v618_v52 = vsel %vm586_vm15, %v519_v14, 0.0 }
 0x10b   : > { %vm587_vm0 = vcmp.ge.f32.partialorder %v425_v15, 0.0  ;;  %v642_v62 = vadd.f32 %v641_v56, %v618_v52  ;;  %v941_v52 = vmov 1966171168  }
 0x10c   : > { %v429_v18 = vpop.f32.mrf.mxu0  ;;  %v525_v19 = vpop.f32.mrf.mxu1  ;;  %v619_v57 = vsel %vm587_vm0, %v521_v16, 0.0 }
 0x10d   : > { %vm588_vm1 = vcmp.ge.f32.partialorder %v429_v18, 0.0  ;;  %v663_v3 = vadd.f32 %v662_v61, %v619_v57 }
 0x10e   : > { %v431_v23 = vpop.f32.mrf.mxu0  ;;  %v527_v24 = vpop.f32.mrf.mxu1  ;;  %v620_v58 = vsel %vm588_vm1, %v525_v19, 0.0 }
 0x10f   : > { %vm589_vm2 = vcmp.ge.f32.partialorder %v431_v23, 0.0  ;;  %v643_v4 = vadd.f32 %v642_v62, %v620_v58 }
 0x110   : > { %v435_v29 = vpop.f32.mrf.mxu0  ;;  %v531_v30 = vpop.f32.mrf.mxu1  ;;  %v621_v63 = vsel %vm589_vm2, %v527_v24, 0.0 }
 0x111   : > { %vm590_vm3 = vcmp.ge.f32.partialorder %v435_v29, 0.0  ;;  %v664_v9 = vadd.f32 %v663_v3, %v621_v63 }
 0x112   : > { %v437_v35 = vpop.f32.mrf.mxu0  ;;  %v533_v36 = vpop.f32.mrf.mxu1  ;;  %v622_v0 = vsel %vm590_vm3, %v531_v30, 0.0 }
 0x113   : > { %vm591_vm4 = vcmp.ge.f32.partialorder %v437_v35, 0.0  ;;  %v644_v10 = vadd.f32 %v643_v4, %v622_v0 }
 0x114   : > { %v441_v41 = vpop.f32.mrf.mxu0  ;;  %v537_v42 = vpop.f32.mrf.mxu1  ;;  %v623_v5 = vsel %vm591_vm4, %v533_v36, 0.0 }
 0x115   : > { %vm592_vm5 = vcmp.ge.f32.partialorder %v441_v41, 0.0  ;;  %v665_v15 = vadd.f32 %v664_v9, %v623_v5 }
 0x116   : > { %v443_v47 = vpop.f32.mrf.mxu0  ;;  %v539_v48 = vpop.f32.mrf.mxu1  ;;  %v624_v6 = vsel %vm592_vm5, %v537_v42, 0.0 }
 0x117   : > { %vm593_vm6 = vcmp.ge.f32.partialorder %v443_v47, 0.0  ;;  %v645_v16 = vadd.f32 %v644_v10, %v624_v6 }
 0x118   : > { %v447_v53 = vpop.f32.mrf.mxu0  ;;  %v543_v54 = vpop.f32.mrf.mxu1  ;;  %v625_v11 = vsel %vm593_vm6, %v539_v48, 0.0 }
 0x119   : > { %vm594_vm7 = vcmp.ge.f32.partialorder %v447_v53, 0.0  ;;  %v666_v21 = vadd.f32 %v665_v15, %v625_v11  ;;  %v682_v53 = vunpack.c.l.s4 %v941_v52 }
 0x11a   : > { %v449_v59 = vpop.f32.mrf.mxu0  ;;  %v545_v60 = vpop.f32.mrf.mxu1  ;;  %v626_v12 = vsel %vm594_vm7, %v543_v54, 0.0  ;;  %v684_v54 = vlaneseq }
 0x11b   : > { %vm595_vm8 = vcmp.ge.f32.partialorder %v449_v59, 0.0  ;;  %v646_v22 = vadd.f32 %v645_v16, %v626_v12  ;;  %v683_v59 = vunpack.c.0.s8 %v682_v53 }
 0x11c   : > { %v453_v1 = vpop.f32.mrf.mxu0  ;;  %v549_v2 = vpop.f32.mrf.mxu1  ;;  %v627_v17 = vsel %vm595_vm8, %v545_v60, 0.0  ;;  %v685_v60 = vshrl.u32 %v684_v54, 7  ;;  %vm698_vm1 = vcmp.lt.s32.totalorder %v684_v54, 256 }
 0x11d   : > { %vm596_vm9 = vcmp.ge.f32.partialorder %v453_v1, 0.0  ;;  %v667_v27 = vadd.f32 %v666_v21, %v627_v17 }
 0x11e   : > { %v455_v7 = vpop.f32.mrf.mxu0  ;;  %v551_v8 = vpop.f32.mrf.mxu1  ;;  %v628_v18 = vsel %vm596_vm9, %v549_v2, 0.0  ;;  %v686_v0 = vsub.s32 %v683_v59, %v685_v60 }
 0x11f   : > { %vm597_vm10 = vcmp.ge.f32.partialorder %v455_v7, 0.0  ;;  %v647_v28 = vadd.f32 %v646_v22, %v628_v18 }
 0x120   : > { %v459_v13 = vpop.f32.mrf.mxu0  ;;  %v555_v14 = vpop.f32.mrf.mxu1  ;;  %v629_v23 = vsel %vm597_vm10, %v551_v8, 0.0 }
 0x121   : > { %vm598_vm11 = vcmp.ge.f32.partialorder %v459_v13, 0.0  ;;  %v668_v33 = vadd.f32 %v667_v27, %v629_v23 }
 0x122   : > { %v461_v19 = vpop.f32.mrf.mxu0  ;;  %v557_v20 = vpop.f32.mrf.mxu1  ;;  %v630_v24 = vsel %vm598_vm11, %v555_v14, 0.0 }
 0x123   : > { %vm599_vm12 = vcmp.ge.f32.partialorder %v461_v19, 0.0  ;;  %v648_v34 = vadd.f32 %v647_v28, %v630_v24 }
 0x124   : > { %v465_v25 = vpop.f32.mrf.mxu0  ;;  %v561_v26 = vpop.f32.mrf.mxu1  ;;  %v631_v29 = vsel %vm599_vm12, %v557_v20, 0.0 }
 0x125   : > { %vm600_vm13 = vcmp.ge.f32.partialorder %v465_v25, 0.0  ;;  %v669_v38 = vadd.f32 %v668_v33, %v631_v29 }
 0x126   : > { %v632_v30 = vsel %vm600_vm13, %v561_v26, 0.0  ;;  %v467_v31 = vpop.f32.mrf.mxu0  ;;  %v563_v32 = vpop.f32.mrf.mxu1 }
 0x127   : > { %vm601_vm14 = vcmp.ge.f32.partialorder %v467_v31, 0.0  ;;  %v649_v39 = vadd.f32 %v648_v34, %v632_v30 }
 0x128   : > { %v633_v35 = vsel %vm601_vm14, %v563_v32, 0.0  ;;  %v471_v36 = vpop.f32.mrf.mxu0  ;;  %v567_v37 = vpop.f32.mrf.mxu1 }
 0x129   : > { %vm602_vm15 = vcmp.ge.f32.partialorder %v471_v36, 0.0  ;;  %v670_v43 = vadd.f32 %v669_v38, %v633_v35 }
 0x12a   : > { %v634_v40 = vsel %vm602_vm15, %v567_v37, 0.0  ;;  %v473_v41 = vpop.f32.mrf.mxu0  ;;  %v569_v42 = vpop.f32.mrf.mxu1 }
 0x12b   : > { %v650_v44 = vadd.f32 %v649_v39, %v634_v40  ;;  %vm603_vm0 = vcmp.ge.f32.partialorder %v473_v41, 0.0 }
 0x12c   : > { %v635_v45 = vsel %vm603_vm0, %v569_v42, 0.0 }
 0x12d   : > { %v651_v46 = vrot.slane %v650_v44, 4  ;;  %v671_v47 = vadd.f32 %v670_v43, %v635_v45 }
 0x12f   : > { %v652_v48 = vadd.f32 %v651_v46, %v650_v44  ;;  %v672_v49 = vrot.slane %v671_v47, 4 }
 0x131   : > { %v653_v50 = vrot.slane %v652_v48, 2  ;;  %v673_v51 = vadd.f32 %v672_v49, %v671_v47 }
 0x133   : > { %v654_v55 = vadd.f32 %v653_v50, %v652_v48  ;;  %v674_v56 = vrot.slane %v673_v51, 2 }
 0x135   : > { %v655_v57 = vrot.slane %v654_v55, 1  ;;  %v675_v58 = vadd.f32 %v674_v56, %v673_v51 }
 0x137   : > { %v676_v61 = vrot.slane %v675_v58, 1  ;;  %v656_v62 = vadd.f32 %v655_v57, %v654_v55 }
 0x139   : > { %v677_v63 = vadd.f32 %v676_v61, %v675_v58 }
 0x13b   : > { %v680_v1 = vcombine.low %v656_v62, %v677_v63 }
 0x13d   : > { %v687_v2 = vrot.slane %v680_v1, %v686_v0 }
 0x13f   : > { %v694_v3 = vrot.slane %v687_v2, %v686_v0 }
 0x141   : > { %700 = vst.msk [vmem:[%s175_s24] sm:$0x3] %vm698_vm1, %v694_v3 }
 0x142   : > { %891 = shalt.err (!%p888_p5)
}
 0x143   : > { %s892_s6 = scalar_lea.hbm %s714_s29, 32  ;;  %s896_s8 = scalar_lea.hbm %s1217_s2, 64 }
 0x144   : > { %p893_p7 = scmp.ne.s32.totalorder %s714_s29, %s892_s6  ;;  %p897_p12 = scmp.lt.s32.totalorder %s714_s29, %s1217_s2 }
 0x145   : > { %p898_p13 = scmp.lt.s32.totalorder %s896_s8, %s892_s6 }
 0x146   : > { %p894_p10 = pnand %p893_p7, %p996_p6 }
 0x147   : > { %p899_p0 = por %p898_p13, %p897_p12 }
 0x148   : > { %p895_p11 = pneg %p894_p10 }
 0x14a   : > { %p900_p9 = pnand %p899_p0, %p895_p11 }
 0x14c   : > { %903 = shalt.err (!%p900_p9)
}
 0x14d   : > { %837 = dma.vmem_to_hbm [thread:$0]  (%p996_p6), %s717_s25, 32, %s714_s29, %s702_s30  }
 0x14e PF: > { %s728_s17 = sand.u32 1, %s926_s9   ;;  %p1221_p1 = scmp.ge.s32.totalorder %s938_s12, 2 }
 0x14f   : > { %s729_s21 = scalar_lea.sflag [#allocation4], %s728_s17 }
 0x150   : > { %p840_p2 = pnand %p1221_p1, %p1000_p8 }
 0x152   : > { %p841_p3 = pneg %p840_p2 }
 0x154   : > { %921 = dma.done.wait (%p841_p3), %s729_s21, 32  }
 0x155   : > { %923 = vsyncadd (%p841_p3), %s729_s21, 4294967264  ;;  %p12_p9 = scmp.ge.s32.totalorder %s981_s15, 4   ;;  %s1222_s9 = smov %s930_s10 }
 0x156   : > { %s1223_s10 = smov %s934_s11  ;;  %s1224_s11 = smov %s994_s18 }
 0x157   : > { %s1225_s12 = smov %s981_s15  ;;  %14 = sbr.rel (!%p12_p9) target bundleno = 3 (0x3), region = 91 }
 0x15c   :  { %734 = vsyncpa [#allocation4], 1 }
 0x15d   :  { %736 = vsyncpa [#allocation4 + $0x1], 1 }

</bundles_post_ra>
